<compile_context>
chip_gen: v6e
topology: v6e:2x2x1
jax: 0.10.0
libtpu: 0.0.40
codegen_flags: <defaults>
</compile_context>

<pallas_src>
import functools

import numpy as np
import jax
import jax.numpy as jnp
from jax.experimental import pallas as pl
from jax.experimental.pallas import tpu as pltpu


def _vmem_spec():
    return pl.BlockSpec(memory_space=pltpu.MemorySpace.VMEM)


_COMPILER_PARAMS = pltpu.CompilerParams(vmem_limit_bytes=48 * 1024 * 1024)


def _round_up(v, m):
    return ((v + m - 1) // m) * m


# ----------------------------------------------------------------------------
# Pallas kernel 1: fused GCN stage
#   h_l = tanh( D^-1 (A+I) (h_{l-1} W_l + b_l) )
#   out[:, off_l : off_l + width_l] = h_l   (lane-dense, 128-padded output)
# ----------------------------------------------------------------------------
def make_gcn_stack_kernel(num_convs):
    def kernel(*refs):
        adj_ref, x_ref = refs[0], refs[1]
        out_ref = refs[-1]
        adj = adj_ref[...]            # row-normalized (A + I), resident in VMEM
        h = x_ref[...]
        off = 0
        for l in range(num_convs):    # static unroll over the (small) layer list
            w_ref = refs[2 + 2 * l]
            b_ref = refs[3 + 2 * l]
            h = jnp.tanh(
                jnp.dot(adj,
                        jnp.dot(h, w_ref[...],
                                preferred_element_type=jnp.float32) + b_ref[...],
                        preferred_element_type=jnp.float32))
            width = w_ref.shape[1]
            # Direct static lane-slice store -> no concat / lane relayout.
            out_ref[:, off:off + width] = h
            off += width
    return kernel


def gcn_stack(norm_adj, x, convs):
    n = x.shape[0]
    true_widths = [w.shape[1] for (w, _) in convs]
    # Pad the LAST layer (its output feeds no further conv) so the total
    # output width is a multiple of 128 -> lane-dense out_ref, unmasked stores.
    lead = sum(true_widths[:-1])
    total_pad = _round_up(sum(true_widths), 128)
    last_pad = total_pad - lead
    assert last_pad >= true_widths[-1]

    flat = []
    for i, (w, b) in enumerate(convs):
        if i == len(convs) - 1 and w.shape[1] != last_pad:
            w = jnp.pad(w, ((0, 0), (0, last_pad - w.shape[1])))
            b = jnp.pad(b, ((0, 0), (0, last_pad - b.shape[1])))
        flat += [w, b]

    return pl.pallas_call(
        make_gcn_stack_kernel(len(convs)),
        out_shape=jax.ShapeDtypeStruct((n, total_pad), jnp.float32),
        in_specs=[_vmem_spec() for _ in range(2 + len(flat))],
        out_specs=_vmem_spec(),
        compiler_params=_COMPILER_PARAMS,
    )(norm_adj, x, *flat)


# ----------------------------------------------------------------------------
# Pallas kernel 2: Conv1d / MaxPool / Conv1d / Dense head (fully batched,
# im2col / flatten folded into weight-block accumulations)
# ----------------------------------------------------------------------------
def make_head_kernel(batch, p_len, l_len):
    def kernel(x_ref, w1_ref, b1_ref, w2_ref, b2_ref, w3_ref, b3_ref,
               w4_ref, b4_ref, out_ref):
        half = p_len * batch
        rows = l_len * batch

        # Conv1d(1, 16, D, D) + ReLU == per-position Linear(D, 16), batched
        # over ALL positions and graphs in one matmul.
        h1 = jnp.maximum(
            jnp.dot(x_ref[...], w1_ref[...], preferred_element_type=jnp.float32)
            + b1_ref[...], 0.0)                              # [2*p_len*B, 16]

        # MaxPool1d(2, 2): even half vs odd half (pure VPU).
        pooled = jnp.maximum(h1[:half, :], h1[half:2 * half, :])   # [p_len*B, 16]

        # Conv1d(16, 32, 5, 1) + ReLU as a 5-tap weight-block accumulation:
        # conv2[p*B + b] = b2 + sum_t pooled[(p+t)*B + b] @ w2[t*16:(t+1)*16]
        conv2 = b2_ref[...]                                  # [1, 32] (broadcast)
        for t in range(5):
            conv2 = conv2 + jnp.dot(
                pooled[t * batch:t * batch + rows, :],
                w2_ref[t * 16:(t + 1) * 16, :],
                preferred_element_type=jnp.float32)
        conv2 = jnp.maximum(conv2, 0.0)                      # [l_len*B, 32]

        # Dense1 with the (position, channel) flatten folded into per-position
        # weight blocks of w3: hidden = relu(b3 + sum_p conv2_p @ w3_p).
        hidden = b3_ref[...]                                 # [1, H] (broadcast)
        for p in range(l_len):
            hidden = hidden + jnp.dot(
                conv2[p * batch:(p + 1) * batch, :],
                w3_ref[p * 32:(p + 1) * 32, :],
                preferred_element_type=jnp.float32)
        hidden = jnp.maximum(hidden, 0.0)                    # [B, H]

        # (Dropout == identity at inference) -> final Linear.
        out_ref[...] = (jnp.dot(hidden, w4_ref[...],
                                preferred_element_type=jnp.float32)
                        + b4_ref[...])
    return kernel


def head_call(x2, params, batch, p_len):
    l_len = p_len - 5 + 1
    dim_target = params['w4'].shape[1]
    return pl.pallas_call(
        make_head_kernel(batch, p_len, l_len),
        out_shape=jax.ShapeDtypeStruct((batch, dim_target), jnp.float32),
        in_specs=[_vmem_spec() for _ in range(9)],
        out_specs=_vmem_spec(),
        compiler_params=_COMPILER_PARAMS,
    )(x2, params['w1'], params['b1'], params['w2'], params['b2'],
      params['w3'], params['b3'], params['w4'], params['b4'])


# ----------------------------------------------------------------------------
# Plain-JAX glue (compiled into the same executable via jax.jit)
# ----------------------------------------------------------------------------
def global_sort_pool(x, node_counts, k):
    # Per-graph descending sort / top-k, batched (node counts are static+equal).
    # Note: sorts only by the last channel (no tie-break on earlier channels).
    count = node_counts[0]
    assert all(c == count for c in node_counts)
    b = len(node_counts)
    d = x.shape[1]
    xg = x.reshape(b, count, d)
    order = jnp.argsort(-xg[:, :, -1], axis=1)            # descending by last channel
    xg = jnp.take_along_axis(xg, order[:, :, None], axis=1)
    if count >= k:
        xg = xg[:, :k, :]
    else:
        xg = jnp.concatenate([xg, jnp.zeros((b, k - count, d), xg.dtype)], axis=1)
    return xg                                             # [B, k, D]


@functools.partial(jax.jit, static_argnums=(2, 3))
def dgcnn_forward(x, norm_adj, node_counts, k, params):
    total_latent = sum(w.shape[1] for (w, _) in params['convs'])
    hcat = gcn_stack(norm_adj, x, params['convs'])[:, :total_latent]
    pooled = global_sort_pool(hcat, node_counts, k)       # [B, k, D]
    b, _, d = pooled.shape
    p_len = k // 2
    # Build head input: even positions block then odd positions block, each
    # ordered (position, batch), so the kernel's pooling is a 2-slice max.
    even = jnp.transpose(pooled[:, 0:2 * p_len:2, :], (1, 0, 2)).reshape(p_len * b, d)
    odd = jnp.transpose(pooled[:, 1:2 * p_len:2, :], (1, 0, 2)).reshape(p_len * b, d)
    x2 = jnp.concatenate([even, odd], axis=0)             # [2*p_len*B, D]
    return head_call(x2, params, b, p_len)                # Pallas: one fused call


def reference_forward(x, norm_adj, node_counts, k, params):
    # Pure jnp reference mirroring the PyTorch forward (for correctness check).
    hidden_repres = []
    h = x
    for (w, b) in params['convs']:
        h = jnp.tanh(norm_adj @ (h @ w + b))
        hidden_repres.append(h)
    xc = jnp.concatenate(hidden_repres, axis=1)
    pooled = global_sort_pool(xc, node_counts, k)         # [B, k, D]
    bsz = pooled.shape[0]
    h1 = jnp.maximum(jnp.einsum('bkd,dc->bkc', pooled, params['w1']) + params['b1'], 0.0)
    p_len = k // 2
    h1 = h1[:, :2 * p_len, :].reshape(bsz, p_len, 2, 16).max(axis=2)   # MaxPool1d(2,2)
    l_len = p_len - 4
    outs = []
    for p in range(l_len):
        window = h1[:, p:p + 5, :].reshape(bsz, 5 * 16)
        outs.append(jnp.maximum(window @ params['w2'] + params['b2'], 0.0))
    flat = jnp.concatenate(outs, axis=1)
    hdn = jnp.maximum(flat @ params['w3'] + params['b3'], 0.0)
    return hdn @ params['w4'] + params['b4']


# ----------------------------------------------------------------------------
# Deterministic parameter / graph construction
# ----------------------------------------------------------------------------
def _uniform(key, shape, fan_in):
    bound = 1.0 / np.sqrt(fan_in)
    return jax.random.uniform(key, shape, jnp.float32, -bound, bound)


def init_params(key, dim_features, dim_target, emb, num_layers, k, hidden_dense):
    total_latent = num_layers * emb + 1
    p_len = k // 2
    l_len = p_len - 5 + 1
    ks = jax.random.split(key, 2 * (num_layers + 1) + 8)
    it = iter(ks)

    conv_dims = [(dim_features if l == 0 else emb, emb) for l in range(num_layers)]
    conv_dims.append((emb, 1))
    convs = []
    for (din, dout) in conv_dims:
        convs.append((_uniform(next(it), (din, dout), din),
                      _uniform(next(it), (1, dout), din)))

    params = {'convs': convs}
    params['w1'] = _uniform(next(it), (total_latent, 16), total_latent)
    params['b1'] = _uniform(next(it), (1, 16), total_latent)
    params['w2'] = _uniform(next(it), (5 * 16, 32), 5 * 16)
    params['b2'] = _uniform(next(it), (1, 32), 5 * 16)
    params['w3'] = _uniform(next(it), (l_len * 32, hidden_dense), l_len * 32)
    params['b3'] = _uniform(next(it), (1, hidden_dense), l_len * 32)
    params['w4'] = _uniform(next(it), (hidden_dense, dim_target), hidden_dense)
    params['b4'] = _uniform(next(it), (1, dim_target), hidden_dense)
    return params


def build_graph(node_counts):
    n = sum(node_counts)
    a = np.zeros((n, n), np.float32)
    off = 0
    for count in node_counts:
        for i in range(count):
            s, d = off + i, off + (i + 1) % count        # ring
            a[s, d] = 1.0
            a[d, s] = 1.0
        a[off + 0, off + 5] = a[off + 5, off + 0] = 1.0  # extra chords
        a[off + 2, off + 7] = a[off + 7, off + 2] = 1.0
        off += count
    a_hat = a + np.eye(n, dtype=np.float32)              # add_self_loops
    deg = a_hat.sum(axis=1)                              # degree(src) incl. self-loop
    # out[dst] = (1/deg[dst]) * sum_src A_hat[src, dst] * x[src]
    norm_adj = (a_hat.T / deg[:, None]).astype(np.float32)
    return jnp.asarray(norm_adj)


# ----------------------------------------------------------------------------
if __name__ == "__main__":
    # config: dataset_name='IMDB-MULTI', k='0.6' -> k=11
    k = 11
    embedding_dim = 32
    num_layers = 3
    dense_dim = 64
    dim_features = 8
    dim_target = 3
    node_counts = (10, 10)          # 2 graphs, 10 nodes each (batch vector)
    n_nodes = sum(node_counts)

    key = jax.random.PRNGKey(0)
    k_feat, k_param = jax.random.split(key)
    x = jax.random.normal(k_feat, (n_nodes, dim_features), jnp.float32)
    norm_adj = build_graph(node_counts)
    params = init_params(k_param, dim_features, dim_target, embedding_dim,
                         num_layers, k, dense_dim)

    out = dgcnn_forward(x, norm_adj, node_counts, k, params)
    out = jax.block_until_ready(out)

    ref = reference_forward(x, norm_adj, node_counts, k, params)
    assert out.shape == (len(node_counts), dim_target)
    assert np.allclose(np.asarray(out), np.asarray(ref), atol=1e-2, rtol=1e-2)

    print("KERNEL_OK")
</pallas_src>

<mosaic_0001>
module attributes {stable_mosaic.version = 11 : i64} {
  func.func @kernel(%arg0: memref<20x20xf32, #tpu.memory_space<vmem>>, %arg1: memref<20x8xf32, #tpu.memory_space<vmem>>, %arg2: memref<8x32xf32, #tpu.memory_space<vmem>>, %arg3: memref<1x32xf32, #tpu.memory_space<vmem>>, %arg4: memref<32x32xf32, #tpu.memory_space<vmem>>, %arg5: memref<1x32xf32, #tpu.memory_space<vmem>>, %arg6: memref<32x32xf32, #tpu.memory_space<vmem>>, %arg7: memref<1x32xf32, #tpu.memory_space<vmem>>, %arg8: memref<32x32xf32, #tpu.memory_space<vmem>>, %arg9: memref<1x32xf32, #tpu.memory_space<vmem>>, %arg10: memref<20x128xf32, #tpu.memory_space<vmem>>) attributes {dimension_semantics = [], scalar_prefetch = 0 : i64, scratch_operands = 0 : i64, tpu.core_type = #tpu.core_type<tc>} {
    %c0 = arith.constant 0 : index
    %c0_0 = arith.constant 0 : index
    %0 = vector.load %arg0[%c0, %c0_0] : memref<20x20xf32, #tpu.memory_space<vmem>>, vector<20x20xf32>
    %c0_1 = arith.constant 0 : index
    %c0_2 = arith.constant 0 : index
    %1 = vector.load %arg1[%c0_1, %c0_2] : memref<20x8xf32, #tpu.memory_space<vmem>>, vector<20x8xf32>
    %c0_3 = arith.constant 0 : index
    %c0_4 = arith.constant 0 : index
    %2 = vector.load %arg2[%c0_3, %c0_4] : memref<8x32xf32, #tpu.memory_space<vmem>>, vector<8x32xf32>
    %cst = arith.constant dense<0.000000e+00> : vector<20x32xf32>
    %3 = tpu.matmul %1, %2, %cst {dimension_numbers = #tpu.dot_dimension_numbers<[1], [0], [0], [1], [0, 0, 1, 1], [], []>} : vector<20x8xf32>, vector<8x32xf32>, vector<20x32xf32> -> vector<20x32xf32>
    %c0_5 = arith.constant 0 : index
    %c0_6 = arith.constant 0 : index
    %4 = vector.load %arg3[%c0_5, %c0_6] : memref<1x32xf32, #tpu.memory_space<vmem>>, vector<1x32xf32>
    %5 = vector.broadcast %4 : vector<1x32xf32> to vector<20x32xf32>
    %6 = arith.addf %3, %5 : vector<20x32xf32>
    %cst_7 = arith.constant dense<0.000000e+00> : vector<20x32xf32>
    %7 = tpu.matmul %0, %6, %cst_7 {dimension_numbers = #tpu.dot_dimension_numbers<[1], [0], [0], [1], [0, 0, 1, 1], [], []>} : vector<20x20xf32>, vector<20x32xf32>, vector<20x32xf32> -> vector<20x32xf32>
    %8 = math.tanh %7 : vector<20x32xf32>
    %c0_8 = arith.constant 0 : index
    %c0_9 = arith.constant 0 : index
    %9 = vector.load %arg10[%c0_8, %c0_9] : memref<20x128xf32, #tpu.memory_space<vmem>>, vector<20x32xf32>
    tpu.vector_store %arg10[%c0_8, %c0_9], %8 {strides = array<i32>} : memref<20x128xf32, #tpu.memory_space<vmem>>, vector<20x32xf32>,
    %c0_10 = arith.constant 0 : index
    %c0_11 = arith.constant 0 : index
    %10 = vector.load %arg4[%c0_10, %c0_11] : memref<32x32xf32, #tpu.memory_space<vmem>>, vector<32x32xf32>
    %cst_12 = arith.constant dense<0.000000e+00> : vector<20x32xf32>
    %11 = tpu.matmul %8, %10, %cst_12 {dimension_numbers = #tpu.dot_dimension_numbers<[1], [0], [0], [1], [0, 0, 1, 1], [], []>} : vector<20x32xf32>, vector<32x32xf32>, vector<20x32xf32> -> vector<20x32xf32>
    %c0_13 = arith.constant 0 : index
    %c0_14 = arith.constant 0 : index
    %12 = vector.load %arg5[%c0_13, %c0_14] : memref<1x32xf32, #tpu.memory_space<vmem>>, vector<1x32xf32>
    %13 = vector.broadcast %12 : vector<1x32xf32> to vector<20x32xf32>
    %14 = arith.addf %11, %13 : vector<20x32xf32>
    %cst_15 = arith.constant dense<0.000000e+00> : vector<20x32xf32>
    %15 = tpu.matmul %0, %14, %cst_15 {dimension_numbers = #tpu.dot_dimension_numbers<[1], [0], [0], [1], [0, 0, 1, 1], [], []>} : vector<20x20xf32>, vector<20x32xf32>, vector<20x32xf32> -> vector<20x32xf32>
    %16 = math.tanh %15 : vector<20x32xf32>
    %c0_16 = arith.constant 0 : index
    %c32 = arith.constant 32 : index
    %17 = vector.load %arg10[%c0_16, %c32] : memref<20x128xf32, #tpu.memory_space<vmem>>, vector<20x32xf32>
    tpu.vector_store %arg10[%c0_16, %c32], %16 {strides = array<i32>} : memref<20x128xf32, #tpu.memory_space<vmem>>, vector<20x32xf32>,
    %c0_17 = arith.constant 0 : index
    %c0_18 = arith.constant 0 : index
    %18 = vector.load %arg6[%c0_17, %c0_18] : memref<32x32xf32, #tpu.memory_space<vmem>>, vector<32x32xf32>
    %cst_19 = arith.constant dense<0.000000e+00> : vector<20x32xf32>
    %19 = tpu.matmul %16, %18, %cst_19 {dimension_numbers = #tpu.dot_dimension_numbers<[1], [0], [0], [1], [0, 0, 1, 1], [], []>} : vector<20x32xf32>, vector<32x32xf32>, vector<20x32xf32> -> vector<20x32xf32>
    %c0_20 = arith.constant 0 : index
    %c0_21 = arith.constant 0 : index
    %20 = vector.load %arg7[%c0_20, %c0_21] : memref<1x32xf32, #tpu.memory_space<vmem>>, vector<1x32xf32>
    %21 = vector.broadcast %20 : vector<1x32xf32> to vector<20x32xf32>
    %22 = arith.addf %19, %21 : vector<20x32xf32>
    %cst_22 = arith.constant dense<0.000000e+00> : vector<20x32xf32>
    %23 = tpu.matmul %0, %22, %cst_22 {dimension_numbers = #tpu.dot_dimension_numbers<[1], [0], [0], [1], [0, 0, 1, 1], [], []>} : vector<20x20xf32>, vector<20x32xf32>, vector<20x32xf32> -> vector<20x32xf32>
    %24 = math.tanh %23 : vector<20x32xf32>
    %c0_23 = arith.constant 0 : index
    %c64 = arith.constant 64 : index
    %25 = vector.load %arg10[%c0_23, %c64] : memref<20x128xf32, #tpu.memory_space<vmem>>, vector<20x32xf32>
    tpu.vector_store %arg10[%c0_23, %c64], %24 {strides = array<i32>} : memref<20x128xf32, #tpu.memory_space<vmem>>, vector<20x32xf32>,
    %c0_24 = arith.constant 0 : index
    %c0_25 = arith.constant 0 : index
    %26 = vector.load %arg8[%c0_24, %c0_25] : memref<32x32xf32, #tpu.memory_space<vmem>>, vector<32x32xf32>
    %cst_26 = arith.constant dense<0.000000e+00> : vector<20x32xf32>
    %27 = tpu.matmul %24, %26, %cst_26 {dimension_numbers = #tpu.dot_dimension_numbers<[1], [0], [0], [1], [0, 0, 1, 1], [], []>} : vector<20x32xf32>, vector<32x32xf32>, vector<20x32xf32> -> vector<20x32xf32>
    %c0_27 = arith.constant 0 : index
    %c0_28 = arith.constant 0 : index
    %28 = vector.load %arg9[%c0_27, %c0_28] : memref<1x32xf32, #tpu.memory_space<vmem>>, vector<1x32xf32>
    %29 = vector.broadcast %28 : vector<1x32xf32> to vector<20x32xf32>
    %30 = arith.addf %27, %29 : vector<20x32xf32>
    %cst_29 = arith.constant dense<0.000000e+00> : vector<20x32xf32>
    %31 = tpu.matmul %0, %30, %cst_29 {dimension_numbers = #tpu.dot_dimension_numbers<[1], [0], [0], [1], [0, 0, 1, 1], [], []>} : vector<20x20xf32>, vector<20x32xf32>, vector<20x32xf32> -> vector<20x32xf32>
    %32 = math.tanh %31 : vector<20x32xf32>
    %c0_30 = arith.constant 0 : index
    %c96 = arith.constant 96 : index
    %33 = vector.load %arg10[%c0_30, %c96] : memref<20x128xf32, #tpu.memory_space<vmem>>, vector<20x32xf32>
    tpu.vector_store %arg10[%c0_30, %c96], %32 {strides = array<i32>} : memref<20x128xf32, #tpu.memory_space<vmem>>, vector<20x32xf32>,
    return
  }
}

module attributes {stable_mosaic.version = 11 : i64} {
  func.func @kernel(%arg0: memref<20x97xf32, #tpu.memory_space<vmem>>, %arg1: memref<97x16xf32, #tpu.memory_space<vmem>>, %arg2: memref<1x16xf32, #tpu.memory_space<vmem>>, %arg3: memref<80x32xf32, #tpu.memory_space<vmem>>, %arg4: memref<1x32xf32, #tpu.memory_space<vmem>>, %arg5: memref<32x64xf32, #tpu.memory_space<vmem>>, %arg6: memref<1x64xf32, #tpu.memory_space<vmem>>, %arg7: memref<64x3xf32, #tpu.memory_space<vmem>>, %arg8: memref<1x3xf32, #tpu.memory_space<vmem>>, %arg9: memref<2x3xf32, #tpu.memory_space<vmem>>) attributes {dimension_semantics = [], scalar_prefetch = 0 : i64, scratch_operands = 0 : i64, tpu.core_type = #tpu.core_type<tc>} {
    %c0 = arith.constant 0 : index
    %c0_0 = arith.constant 0 : index
    %0 = vector.load %arg0[%c0, %c0_0] : memref<20x97xf32, #tpu.memory_space<vmem>>, vector<20x97xf32>
    %c0_1 = arith.constant 0 : index
    %c0_2 = arith.constant 0 : index
    %1 = vector.load %arg1[%c0_1, %c0_2] : memref<97x16xf32, #tpu.memory_space<vmem>>, vector<97x16xf32>
    %cst = arith.constant dense<0.000000e+00> : vector<20x16xf32>
    %2 = tpu.matmul %0, %1, %cst {dimension_numbers = #tpu.dot_dimension_numbers<[1], [0], [0], [1], [0, 0, 1, 1], [], []>} : vector<20x97xf32>, vector<97x16xf32>, vector<20x16xf32> -> vector<20x16xf32>
    %c0_3 = arith.constant 0 : index
    %c0_4 = arith.constant 0 : index
    %3 = vector.load %arg2[%c0_3, %c0_4] : memref<1x16xf32, #tpu.memory_space<vmem>>, vector<1x16xf32>
    %4 = vector.broadcast %3 : vector<1x16xf32> to vector<20x16xf32>
    %5 = arith.addf %2, %4 : vector<20x16xf32>
    %cst_5 = arith.constant 0.000000e+00 : f32
    %6 = vector.broadcast %cst_5 : f32 to vector<20x16xf32>
    %7 = arith.maximumf %5, %6 : vector<20x16xf32>
    %8 = vector.extract_strided_slice %7 {offsets = [0, 0], sizes = [10, 16], strides = [1, 1]} : vector<20x16xf32> to vector<10x16xf32>
    %9 = vector.extract_strided_slice %7 {offsets = [10, 0], sizes = [10, 16], strides = [1, 1]} : vector<20x16xf32> to vector<10x16xf32>
    %10 = arith.maximumf %8, %9 : vector<10x16xf32>
    %c0_6 = arith.constant 0 : index
    %c0_7 = arith.constant 0 : index
    %11 = vector.load %arg4[%c0_6, %c0_7] : memref<1x32xf32, #tpu.memory_space<vmem>>, vector<1x32xf32>
    %12 = vector.extract_strided_slice %10 {offsets = [0, 0], sizes = [2, 16], strides = [1, 1]} : vector<10x16xf32> to vector<2x16xf32>
    %c0_8 = arith.constant 0 : index
    %c0_9 = arith.constant 0 : index
    %13 = vector.load %arg3[%c0_8, %c0_9] : memref<80x32xf32, #tpu.memory_space<vmem>>, vector<16x32xf32>
    %cst_10 = arith.constant dense<0.000000e+00> : vector<2x32xf32>
    %14 = tpu.matmul %12, %13, %cst_10 {dimension_numbers = #tpu.dot_dimension_numbers<[1], [0], [0], [1], [0, 0, 1, 1], [], []>} : vector<2x16xf32>, vector<16x32xf32>, vector<2x32xf32> -> vector<2x32xf32>
    %15 = vector.broadcast %11 : vector<1x32xf32> to vector<2x32xf32>
    %16 = arith.addf %15, %14 : vector<2x32xf32>
    %17 = vector.extract_strided_slice %10 {offsets = [2, 0], sizes = [2, 16], strides = [1, 1]} : vector<10x16xf32> to vector<2x16xf32>
    %c16 = arith.constant 16 : index
    %c0_11 = arith.constant 0 : index
    %18 = vector.load %arg3[%c16, %c0_11] : memref<80x32xf32, #tpu.memory_space<vmem>>, vector<16x32xf32>
    %cst_12 = arith.constant dense<0.000000e+00> : vector<2x32xf32>
    %19 = tpu.matmul %17, %18, %cst_12 {dimension_numbers = #tpu.dot_dimension_numbers<[1], [0], [0], [1], [0, 0, 1, 1], [], []>} : vector<2x16xf32>, vector<16x32xf32>, vector<2x32xf32> -> vector<2x32xf32>
    %20 = arith.addf %16, %19 : vector<2x32xf32>
    %21 = vector.extract_strided_slice %10 {offsets = [4, 0], sizes = [2, 16], strides = [1, 1]} : vector<10x16xf32> to vector<2x16xf32>
    %c32 = arith.constant 32 : index
    %c0_13 = arith.constant 0 : index
    %22 = vector.load %arg3[%c32, %c0_13] : memref<80x32xf32, #tpu.memory_space<vmem>>, vector<16x32xf32>
    %cst_14 = arith.constant dense<0.000000e+00> : vector<2x32xf32>
    %23 = tpu.matmul %21, %22, %cst_14 {dimension_numbers = #tpu.dot_dimension_numbers<[1], [0], [0], [1], [0, 0, 1, 1], [], []>} : vector<2x16xf32>, vector<16x32xf32>, vector<2x32xf32> -> vector<2x32xf32>
    %24 = arith.addf %20, %23 : vector<2x32xf32>
    %25 = vector.extract_strided_slice %10 {offsets = [6, 0], sizes = [2, 16], strides = [1, 1]} : vector<10x16xf32> to vector<2x16xf32>
    %c48 = arith.constant 48 : index
    %c0_15 = arith.constant 0 : index
    %26 = vector.load %arg3[%c48, %c0_15] : memref<80x32xf32, #tpu.memory_space<vmem>>, vector<16x32xf32>
    %cst_16 = arith.constant dense<0.000000e+00> : vector<2x32xf32>
    %27 = tpu.matmul %25, %26, %cst_16 {dimension_numbers = #tpu.dot_dimension_numbers<[1], [0], [0], [1], [0, 0, 1, 1], [], []>} : vector<2x16xf32>, vector<16x32xf32>, vector<2x32xf32> -> vector<2x32xf32>
    %28 = arith.addf %24, %27 : vector<2x32xf32>
    %29 = vector.extract_strided_slice %10 {offsets = [8, 0], sizes = [2, 16], strides = [1, 1]} : vector<10x16xf32> to vector<2x16xf32>
    %c64 = arith.constant 64 : index
    %c0_17 = arith.constant 0 : index
    %30 = vector.load %arg3[%c64, %c0_17] : memref<80x32xf32, #tpu.memory_space<vmem>>, vector<16x32xf32>
    %cst_18 = arith.constant dense<0.000000e+00> : vector<2x32xf32>
    %31 = tpu.matmul %29, %30, %cst_18 {dimension_numbers = #tpu.dot_dimension_numbers<[1], [0], [0], [1], [0, 0, 1, 1], [], []>} : vector<2x16xf32>, vector<16x32xf32>, vector<2x32xf32> -> vector<2x32xf32>
    %32 = arith.addf %28, %31 : vector<2x32xf32>
    %cst_19 = arith.constant 0.000000e+00 : f32
    %33 = vector.broadcast %cst_19 : f32 to vector<2x32xf32>
    %34 = arith.maximumf %32, %33 : vector<2x32xf32>
    %c0_20 = arith.constant 0 : index
    %c0_21 = arith.constant 0 : index
    %35 = vector.load %arg6[%c0_20, %c0_21] : memref<1x64xf32, #tpu.memory_space<vmem>>, vector<1x64xf32>
    %c0_22 = arith.constant 0 : index
    %c0_23 = arith.constant 0 : index
    %36 = vector.load %arg5[%c0_22, %c0_23] : memref<32x64xf32, #tpu.memory_space<vmem>>, vector<32x64xf32>
    %cst_24 = arith.constant dense<0.000000e+00> : vector<2x64xf32>
    %37 = tpu.matmul %34, %36, %cst_24 {dimension_numbers = #tpu.dot_dimension_numbers<[1], [0], [0], [1], [0, 0, 1, 1], [], []>} : vector<2x32xf32>, vector<32x64xf32>, vector<2x64xf32> -> vector<2x64xf32>
    %38 = vector.broadcast %35 : vector<1x64xf32> to vector<2x64xf32>
    %39 = arith.addf %38, %37 : vector<2x64xf32>
    %cst_25 = arith.constant 0.000000e+00 : f32
    %40 = vector.broadcast %cst_25 : f32 to vector<2x64xf32>
    %41 = arith.maximumf %39, %40 : vector<2x64xf32>
    %c0_26 = arith.constant 0 : index
    %c0_27 = arith.constant 0 : index
    %42 = vector.load %arg7[%c0_26, %c0_27] : memref<64x3xf32, #tpu.memory_space<vmem>>, vector<64x3xf32>
    %cst_28 = arith.constant dense<0.000000e+00> : vector<2x3xf32>
    %43 = tpu.matmul %41, %42, %cst_28 {dimension_numbers = #tpu.dot_dimension_numbers<[1], [0], [0], [1], [0, 0, 1, 1], [], []>} : vector<2x64xf32>, vector<64x3xf32>, vector<2x3xf32> -> vector<2x3xf32>
    %c0_29 = arith.constant 0 : index
    %c0_30 = arith.constant 0 : index
    %44 = vector.load %arg8[%c0_29, %c0_30] : memref<1x3xf32, #tpu.memory_space<vmem>>, vector<1x3xf32>
    %45 = vector.broadcast %44 : vector<1x3xf32> to vector<2x3xf32>
    %46 = arith.addf %43, %45 : vector<2x3xf32>
    %c0_31 = arith.constant 0 : index
    %c0_32 = arith.constant 0 : index
    %47 = vector.load %arg9[%c0_31, %c0_32] : memref<2x3xf32, #tpu.memory_space<vmem>>, vector<2x3xf32>
    tpu.vector_store %arg9[%c0_31, %c0_32], %46 {strides = array<i32>} : memref<2x3xf32, #tpu.memory_space<vmem>>, vector<2x3xf32>,
    return
  }
}

</mosaic_0001>

<bundles_post_ra>
// kernel: dgcnn_forward.2
= control target key start
LH: loop header
LB: loop body
LE: loop exit
PB: predicated region body
PF: predicated region fallthrough
CT: control target
= control target key end

     0   :  { %vm49_vm0 = vcmask 64512   ;;  %v1080_v0 = vmov 0.0   ;;  %vm1081_vm1 = vmmov 0   ;;  %vm149_vm2 = vcmask 1043456   ;;  %s1082_s24 = smov 32   ;;  %s1366_s2 = inlined_call_operand.vmem [shape: f32[8,32], index: 2, kind: input, shape index: {}]   ;;  %s1367_s1 = inlined_call_operand.vmem [shape: f32[20,8], index: 1, kind: input, shape index: {}]   ;;  %s1368_s3 = inlined_call_operand.vmem [shape: f32[1,32], index: 3, kind: input, shape index: {}]   ;;  %s1369_s0 = inlined_call_operand.vmem [shape: f32[20,20], index: 0, kind: input, shape index: {}]   ;;  %s1370_s4 = inlined_call_operand.vmem [shape: f32[32,32], index: 4, kind: input, shape index: {}]   ;;  %s1371_s10 = inlined_call_operand.vmem [shape: f32[20,128], index: 10, kind: output, shape index: {}]   ;;  %s1372_s5 = inlined_call_operand.vmem [shape: f32[1,32], index: 5, kind: input, shape index: {}]   ;;  %s1373_s6 = inlined_call_operand.vmem [shape: f32[32,32], index: 6, kind: input, shape index: {}]   ;;  %s1374_s7 = inlined_call_operand.vmem [shape: f32[1,32], index: 7, kind: input, shape index: {}]   ;;  %s1375_s8 = inlined_call_operand.vmem [shape: f32[32,32], index: 8, kind: input, shape index: {}]   ;;  %s1376_s9 = inlined_call_operand.vmem [shape: f32[1,32], index: 9, kind: input, shape index: {}]  }
   0x1   :  { %929 = vmatprep.subr.mxu0 %v1080_v0  ;;  %v41_v1 = vld [vmem:[%s1366_s2] sm:$0xff]  ;;  %931 = vmatprep.mubr.msk.f32.mxu0 %vm1081_vm1, %v1080_v0  ;;  %v39_v3 = vld [vmem:[%s1367_s1 + $0x8] sm:$0xff]  ;;  %v40_v4 = vld [vmem:[%s1367_s1 + $0x10] sm:$0xf]  ;;  %vm139_vm3 = vcmask 162816   ;;  %vm236_vm4 = vcmask 261120  }
   0x2   :  { %v38_v2 = vld [vmem:[%s1367_s1] sm:$0xff]  ;;  %930 = vmatpush3.msra.mxu0 %v41_v1  ;;  %940 = vmatprep.subr.mxu1 %v1080_v0  ;;  %v1187_v16 = vld [vmem:[%s1369_s0 + $0x8] sm:$0xff]  ;;  %v1196_v17 = vld [vmem:[%s1369_s0 + $0x10] sm:$0xf]  ;;  %vm239_vm5 = vcmask 257024   ;;  %vm439_vm6 = vcmask 523520  }
   0x3   :  { %932 = vmatmul.mubr.msk.f32.vlgmr.msra.gmra.mxu0 %vm49_vm0, %v38_v2  ;;  %946 = vmatprep.mubr.msk.f32.mxu1 %vm1081_vm1, %v1080_v0  ;;  %v848_v9 = vld [vmem:[%s1368_s3] ss:$0 sm:$0xff]  ;;  %v244_v18 = vld [vmem:[%s1370_s4 + $0x18] sm:$0xff]  ;;  %v243_v19 = vld [vmem:[%s1370_s4 + $0x10] sm:$0xff]  ;;  %vm442_vm7 = vcmask 519424   ;;  %s1083_s2 = smov 64  }
   0x4   :  { %934 = vmatprep.mubr.msk.f32.mxu0 %vm1081_vm1, %v1080_v0  ;;  %955 = vmatprep.subr.mxu0 %v1080_v0  ;;  %v1176_v15 = vld [vmem:[%s1369_s0] sm:$0xff]  ;;  %v242_v20 = vld [vmem:[%s1370_s4 + $0x8] sm:$0xff]  ;;  %v447_v41 = vld [vmem:[%s1373_s6 + $0x18] sm:$0xff]  ;;  %vm639_vm8 = vcmask 785920   ;;  %vm642_vm9 = vcmask 781824   ;;  %vm839_vm10 = vcmask 1048320  }
   0x5   :  { %956 = vmatpush3.msra.mxu0 %v244_v18  ;;  %v241_v21 = vld [vmem:[%s1370_s4] sm:$0xff]  ;;  %v446_v42 = vld [vmem:[%s1373_s6 + $0x10] sm:$0xff]  ;;  %v445_v43 = vld [vmem:[%s1373_s6 + $0x8] sm:$0xff]  ;;  %vm842_vm11 = vcmask 1044224  }
   0x6   :  { %957 = vmatprep.subr.mxu0 %v1080_v0  ;;  %v856_v35 = vld [vmem:[%s1372_s5] ss:$0 sm:$0xff] }
   0x7   :  { %935 = vmatmul.mubr.msk.f32.gmra.mxu0 %vm49_vm0, %v39_v3  ;;  %v444_v44 = vld [vmem:[%s1373_s6] sm:$0xff] }
   0x8   :  { %937 = vmatprep.mubr.msk.f32.mxu0 %vm1081_vm1, %v1080_v0  ;;  %958 = vmatpush3.msra.mxu0 %v243_v19  ;;  %v864_v61 = vld [vmem:[%s1374_s7] ss:$0 sm:$0xff] }
   0x9   :  { %959 = vmatprep.subr.mxu0 %v1080_v0 }
   0xa   :  { %960 = vmatpush3.msra.mxu0 %v242_v20 }
   0xb   :  { %938 = vmatmul.mubr.msk.f32.gmra.mxu0 %vm49_vm0, %v40_v4  ;;  %961 = vmatprep.subr.mxu0 %v1080_v0  ;;  %v647_v4 = vld [vmem:[%s1375_s8 + $0x18] sm:$0xff] }
   0xc   :  { %963 = vmatprep.mubr.msk.f32.mxu0 %vm1081_vm1, %v1080_v0  ;;  %962 = vmatpush3.msra.mxu0 %v241_v21 }
   0xd   :  { %987 = vmatprep.subr.mxu0 %v1080_v0 }
  0xc3   :  { %v125_v5 = vpop.f32.mrf.mxu0 }
  0xc4   :  { %v126_v14 = vadd.f32 %v848_v9, %v125_v5  ;;  %v646_v5 = vld [vmem:[%s1375_s8 + $0x10] sm:$0xff] }
  0xc5   :  { %v933_v6 = vpop.f32.mrf.mxu0 }
  0xc6   :  { %v645_v6 = vld [vmem:[%s1375_s8 + $0x8] sm:$0xff] }
  0xc7   :  { %v130_v7 = vpop.f32.mrf.mxu0 }
  0xc8   :  { %v131_v13 = vadd.f32 %v848_v9, %v130_v7  ;;  %v644_v7 = vld [vmem:[%s1375_s8] sm:$0xff] }
  0xc9   :  { %v936_v8 = vpop.f32.mrf.mxu0 }
  0xcb   :  { %v135_v10 = vpop.f32.mrf.mxu0 }
  0xcc   :  { %v136_v11 = vadd.f32 %v848_v9, %v135_v10 }
  0xcd   :  { %v939_v12 = vpop.f32.mrf.mxu0 }
  0xce   :  { %941 = vmatpush3.msk.msra.mxu1 %vm149_vm2, %v136_v11 }
  0xcf   :  { %942 = vmatprep.subr.mxu1 %v1080_v0 }
  0xd0   :  { %943 = vmatpush3.msra.mxu1 %v131_v13 }
  0xd1   :  { %944 = vmatprep.subr.mxu1 %v1080_v0 }
  0xd2   :  { %945 = vmatpush3.msra.mxu1 %v126_v14 }
  0xd3   :  { %947 = vmatmul.mubr.msk.f32.vlgmr.msra.gmra.mxu1 %vm139_vm3, %v1176_v15  ;;  %972 = vmatprep.subr.mxu1 %v1080_v0 }
  0xd4   :  { %949 = vmatprep.mubr.msk.f32.mxu1 %vm1081_vm1, %v1080_v0 }
  0xd7   :  { %950 = vmatmul.mubr.msk.f32.gmra.mxu1 %vm139_vm3, %v1187_v16 }
  0xd8   :  { %952 = vmatprep.mubr.msk.f32.mxu1 %vm1081_vm1, %v1080_v0 }
  0xdb   :  { %953 = vmatmul.mubr.msk.f32.gmra.mxu1 %vm139_vm3, %v1196_v17 }
  0xdc   :  { %978 = vmatprep.mubr.msk.f32.mxu1 %vm1081_vm1, %v1080_v0 }
 0x193   :  { %v219_v22 = vpop.f32.mrf.mxu1 }
 0x194   :  { %1056 = vtanh.f32 %v219_v22 }
 0x195   :  { %v948_v23 = vpop.f32.mrf.mxu1 }
 0x197   :  { %v224_v24 = vpop.f32.mrf.mxu1 }
 0x198   :  { %1058 = vtanh.f32 %v224_v24 }
 0x199   :  { %v951_v25 = vpop.f32.mrf.mxu1 }
 0x19b   :  { %v229_v26 = vpop.f32.mrf.mxu1 }
 0x19c   :  { %1060 = vtanh.f32 %v229_v26 }
 0x19d   :  { %v954_v27 = vpop.f32.mrf.mxu1 }
 0x19e   :  { %v872_v27 = vld [vmem:[%s1376_s9] ss:$0 sm:$0xff]  ;;  %s1084_s9 = smov 96  }
 0x1a1   :  { %v1057_v28 = vpop.eup %1056 }
 0x1a2   :  { %964 = vmatmul.mubr.msk.f32.vlgmr.msra.gmra.mxu0 %vm236_vm4, %v1057_v28  ;;  %237 = vst.msk [vmem:[%s1371_s10] sm:$0xff] %vm236_vm4, %v1057_v28 }
 0x1a3   :  { %966 = vmatprep.mubr.msk.f32.mxu0 %vm1081_vm1, %v1080_v0  ;;  %988 = vmatpush3.msra.mxu0 %v447_v41 }
 0x1a4   :  { %989 = vmatprep.subr.mxu0 %v1080_v0 }
 0x1a5   :  { %v1059_v29 = vpop.eup %1058  ;;  %990 = vmatpush3.msra.mxu0 %v446_v42 }
 0x1a6   :  { %967 = vmatmul.mubr.msk.f32.gmra.mxu0 %vm236_vm4, %v1059_v29  ;;  %238 = vst.msk [vmem:[%s1371_s10 + $0x8] sm:$0xff] %vm236_vm4, %v1059_v29  ;;  %991 = vmatprep.subr.mxu0 %v1080_v0 }
 0x1a7   :  { %969 = vmatprep.mubr.msk.f32.mxu0 %vm1081_vm1, %v1080_v0  ;;  %992 = vmatpush3.msra.mxu0 %v445_v43 }
 0x1a8   :  { %993 = vmatprep.subr.mxu0 %v1080_v0 }
 0x1a9   :  { %v1061_v30 = vpop.eup %1060  ;;  %994 = vmatpush3.msra.mxu0 %v444_v44 }
 0x1aa   :  { %970 = vmatmul.mubr.msk.f32.gmra.mxu0 %vm236_vm4, %v1061_v30  ;;  %240 = vst.msk [vmem:[%s1371_s10 + $0x10] sm:$0xf] %vm239_vm5, %v1061_v30  ;;  %1019 = vmatprep.subr.mxu0 %v1080_v0 }
 0x1ab   :  { %995 = vmatprep.mubr.msk.f32.mxu0 %vm1081_vm1, %v1080_v0 }
 0x262   :  { %v327_v31 = vpop.f32.mrf.mxu0 }
 0x263   :  { %v328_v40 = vadd.f32 %v856_v35, %v327_v31 }
 0x264   :  { %v965_v32 = vpop.f32.mrf.mxu0 }
 0x266   :  { %v332_v33 = vpop.f32.mrf.mxu0 }
 0x267   :  { %v333_v39 = vadd.f32 %v856_v35, %v332_v33 }
 0x268   :  { %v968_v34 = vpop.f32.mrf.mxu0 }
 0x26a   :  { %v337_v36 = vpop.f32.mrf.mxu0 }
 0x26b   :  { %v338_v37 = vadd.f32 %v856_v35, %v337_v36 }
 0x26c   :  { %v971_v38 = vpop.f32.mrf.mxu0 }
 0x26d   :  { %973 = vmatpush3.msk.msra.mxu1 %vm149_vm2, %v338_v37 }
 0x26e   :  { %974 = vmatprep.subr.mxu1 %v1080_v0 }
 0x26f   :  { %975 = vmatpush3.msra.mxu1 %v333_v39 }
 0x270   :  { %976 = vmatprep.subr.mxu1 %v1080_v0 }
 0x271   :  { %977 = vmatpush3.msra.mxu1 %v328_v40 }
 0x272   :  { %979 = vmatmul.mubr.msk.f32.vlgmr.msra.gmra.mxu1 %vm139_vm3, %v1176_v15  ;;  %1004 = vmatprep.subr.mxu1 %v1080_v0 }
 0x273   :  { %981 = vmatprep.mubr.msk.f32.mxu1 %vm1081_vm1, %v1080_v0 }
 0x276   :  { %982 = vmatmul.mubr.msk.f32.gmra.mxu1 %vm139_vm3, %v1187_v16 }
 0x277   :  { %984 = vmatprep.mubr.msk.f32.mxu1 %vm1081_vm1, %v1080_v0 }
 0x27a   :  { %985 = vmatmul.mubr.msk.f32.gmra.mxu1 %vm139_vm3, %v1196_v17 }
 0x27b   :  { %1010 = vmatprep.mubr.msk.f32.mxu1 %vm1081_vm1, %v1080_v0 }
 0x332   :  { %v410_v45 = vpop.f32.mrf.mxu1 }
 0x333   :  { %1062 = vtanh.f32 %v410_v45 }
 0x334   :  { %v980_v46 = vpop.f32.mrf.mxu1 }
 0x336   :  { %v415_v47 = vpop.f32.mrf.mxu1 }
 0x337   :  { %1064 = vtanh.f32 %v415_v47 }
 0x338   :  { %v983_v48 = vpop.f32.mrf.mxu1 }
 0x33a   :  { %v420_v49 = vpop.f32.mrf.mxu1 }
 0x33b   :  { %1066 = vtanh.f32 %v420_v49 }
 0x33c   :  { %v986_v50 = vpop.f32.mrf.mxu1 }
 0x340   :  { %v1063_v51 = vpop.eup %1062 }
 0x341   :  { %430 = vrot.lane.b32.xlu0 %v1063_v51, %s1082_s24  ;;  %996 = vmatmul.mubr.msk.f32.vlgmr.msra.gmra.mxu0 %vm236_vm4, %v1063_v51 }
 0x342   :  { %998 = vmatprep.mubr.msk.f32.mxu0 %vm1081_vm1, %v1080_v0  ;;  %1020 = vmatpush3.msra.mxu0 %v647_v4 }
 0x343   :  { %1021 = vmatprep.subr.mxu0 %v1080_v0 }
 0x344   :  { %v1065_v52 = vpop.eup %1064  ;;  %1022 = vmatpush3.msra.mxu0 %v646_v5 }
 0x345   :  { %432 = vrot.lane.b32.xlu0 %v1065_v52, %s1082_s24  ;;  %999 = vmatmul.mubr.msk.f32.gmra.mxu0 %vm236_vm4, %v1065_v52 }
 0x346   :  { %1001 = vmatprep.mubr.msk.f32.mxu0 %vm1081_vm1, %v1080_v0  ;;  %1023 = vmatprep.subr.mxu0 %v1080_v0 }
 0x347   :  { %1024 = vmatpush3.msra.mxu0 %v645_v6 }
 0x348   :  { %v1067_v53 = vpop.eup %1066  ;;  %1025 = vmatprep.subr.mxu0 %v1080_v0 }
 0x349   :  { %434 = vrot.lane.b32.xlu1 %v1067_v53, %s1082_s24  ;;  %1002 = vmatmul.mubr.msk.f32.gmra.mxu0 %vm236_vm4, %v1067_v53 }
 0x34a   :  { %1027 = vmatprep.mubr.msk.f32.mxu0 %vm1081_vm1, %v1080_v0  ;;  %1026 = vmatpush3.msra.mxu0 %v644_v7 }
 0x3b3   :  { %v431_v54 = vpop.permute.xlu0 %430 }
 0x3b4   :  { %440 = vst.msk [vmem:[%s1371_s10] sm:$0xff] %vm439_vm6, %v431_v54 }
 0x3b7   :  { %v433_v55 = vpop.permute.xlu0 %432 }
 0x3b8   :  { %441 = vst.msk [vmem:[%s1371_s10 + $0x8] sm:$0xff] %vm439_vm6, %v433_v55 }
 0x3bb   :  { %v435_v56 = vpop.permute.xlu1 %434 }
 0x3bc   :  { %443 = vst.msk [vmem:[%s1371_s10 + $0x10] sm:$0xf] %vm442_vm7, %v435_v56 }
 0x401   :  { %v527_v57 = vpop.f32.mrf.mxu0 }
 0x402   :  { %v528_v3 = vadd.f32 %v864_v61, %v527_v57 }
 0x403   :  { %v997_v58 = vpop.f32.mrf.mxu0 }
 0x405   :  { %v532_v59 = vpop.f32.mrf.mxu0 }
 0x406   :  { %v533_v2 = vadd.f32 %v864_v61, %v532_v59 }
 0x407   :  { %v1000_v60 = vpop.f32.mrf.mxu0 }
 0x409   :  { %v537_v62 = vpop.f32.mrf.mxu0 }
 0x40a   :  { %v538_v63 = vadd.f32 %v864_v61, %v537_v62 }
 0x40b   :  { %v1003_v1 = vpop.f32.mrf.mxu0 }
 0x40c   :  { %1005 = vmatpush3.msk.msra.mxu1 %vm149_vm2, %v538_v63 }
 0x40d   :  { %1006 = vmatprep.subr.mxu1 %v1080_v0 }
 0x40e   :  { %1007 = vmatpush3.msra.mxu1 %v533_v2 }
 0x40f   :  { %1008 = vmatprep.subr.mxu1 %v1080_v0 }
 0x410   :  { %1009 = vmatpush3.msra.mxu1 %v528_v3 }
 0x411   :  { %1011 = vmatmul.mubr.msk.f32.vlgmr.msra.gmra.mxu1 %vm139_vm3, %v1176_v15  ;;  %1036 = vmatprep.subr.mxu1 %v1080_v0 }
 0x412   :  { %1013 = vmatprep.mubr.msk.f32.mxu1 %vm1081_vm1, %v1080_v0 }
 0x415   :  { %1014 = vmatmul.mubr.msk.f32.gmra.mxu1 %vm139_vm3, %v1187_v16 }
 0x416   :  { %1016 = vmatprep.mubr.msk.f32.mxu1 %vm1081_vm1, %v1080_v0 }
 0x419   :  { %1017 = vmatmul.mubr.msk.f32.gmra.mxu1 %vm139_vm3, %v1196_v17 }
 0x41a   :  { %1042 = vmatprep.mubr.msk.f32.mxu1 %vm1081_vm1, %v1080_v0 }
 0x4d1   :  { %v610_v8 = vpop.f32.mrf.mxu1 }
 0x4d2   :  { %1068 = vtanh.f32 %v610_v8 }
 0x4d3   :  { %v1012_v9 = vpop.f32.mrf.mxu1 }
 0x4d5   :  { %v615_v10 = vpop.f32.mrf.mxu1 }
 0x4d6   :  { %1070 = vtanh.f32 %v615_v10 }
 0x4d7   :  { %v1015_v11 = vpop.f32.mrf.mxu1 }
 0x4d9   :  { %v620_v12 = vpop.f32.mrf.mxu1 }
 0x4da   :  { %1072 = vtanh.f32 %v620_v12 }
 0x4db   :  { %v1018_v13 = vpop.f32.mrf.mxu1 }
 0x4df   :  { %v1069_v14 = vpop.eup %1068 }
 0x4e0   :  { %630 = vrot.lane.b32.xlu1 %v1069_v14, %s1083_s2  ;;  %1028 = vmatmul.mubr.msk.f32.vlgmr.msra.gmra.mxu0 %vm236_vm4, %v1069_v14 }
 0x4e1   :  { %1030 = vmatprep.mubr.msk.f32.mxu0 %vm1081_vm1, %v1080_v0 }
 0x4e3   :  { %v1071_v18 = vpop.eup %1070 }
 0x4e4   :  { %632 = vrot.lane.b32.xlu0 %v1071_v18, %s1083_s2  ;;  %1031 = vmatmul.mubr.msk.f32.gmra.mxu0 %vm236_vm4, %v1071_v18 }
 0x4e5   :  { %1033 = vmatprep.mubr.msk.f32.mxu0 %vm1081_vm1, %v1080_v0 }
 0x4e7   :  { %v1073_v19 = vpop.eup %1072 }
 0x4e8   :  { %634 = vrot.lane.b32.xlu1 %v1073_v19, %s1083_s2  ;;  %1034 = vmatmul.mubr.msk.f32.gmra.mxu0 %vm236_vm4, %v1073_v19 }
 0x552   :  { %v631_v20 = vpop.permute.xlu1 %630 }
 0x553   :  { %640 = vst.msk [vmem:[%s1371_s10] sm:$0xff] %vm639_vm8, %v631_v20 }
 0x556   :  { %v633_v21 = vpop.permute.xlu0 %632 }
 0x557   :  { %641 = vst.msk [vmem:[%s1371_s10 + $0x8] sm:$0xff] %vm639_vm8, %v633_v21 }
 0x55a   :  { %v635_v22 = vpop.permute.xlu1 %634 }
 0x55b   :  { %643 = vst.msk [vmem:[%s1371_s10 + $0x10] sm:$0xf] %vm642_vm9, %v635_v22 }
 0x5a0   :  { %v727_v23 = vpop.f32.mrf.mxu0 }
 0x5a1   :  { %v728_v32 = vadd.f32 %v872_v27, %v727_v23 }
 0x5a2   :  { %v1029_v24 = vpop.f32.mrf.mxu0 }
 0x5a4   :  { %v732_v25 = vpop.f32.mrf.mxu0 }
 0x5a5   :  { %v733_v31 = vadd.f32 %v872_v27, %v732_v25 }
 0x5a6   :  { %v1032_v26 = vpop.f32.mrf.mxu0 }
 0x5a8   :  { %v737_v28 = vpop.f32.mrf.mxu0 }
 0x5a9   :  { %v738_v29 = vadd.f32 %v872_v27, %v737_v28 }
 0x5aa   :  { %v1035_v30 = vpop.f32.mrf.mxu0 }
 0x5ab   :  { %1037 = vmatpush3.msk.msra.mxu1 %vm149_vm2, %v738_v29 }
 0x5ac   :  { %1038 = vmatprep.subr.mxu1 %v1080_v0 }
 0x5ad   :  { %1039 = vmatpush3.msra.mxu1 %v733_v31 }
 0x5ae   :  { %1040 = vmatprep.subr.mxu1 %v1080_v0 }
 0x5af   :  { %1041 = vmatpush3.msra.mxu1 %v728_v32 }
 0x5b0   :  { %1043 = vmatmul.mubr.msk.f32.vlgmr.msra.gmra.mxu1 %vm139_vm3, %v1176_v15 }
 0x5b1   :  { %1045 = vmatprep.mubr.msk.f32.mxu1 %vm1081_vm1, %v1080_v0 }
 0x5b4   :  { %1046 = vmatmul.mubr.msk.f32.gmra.mxu1 %vm139_vm3, %v1187_v16 }
 0x5b5   :  { %1048 = vmatprep.mubr.msk.f32.mxu1 %vm1081_vm1, %v1080_v0 }
 0x5b8   :  { %1049 = vmatmul.mubr.msk.f32.gmra.mxu1 %vm139_vm3, %v1196_v17 }
 0x670   :  { %v810_v33 = vpop.f32.mrf.mxu1 }
 0x671   :  { %1074 = vtanh.f32 %v810_v33 }
 0x672   :  { %v1044_v34 = vpop.f32.mrf.mxu1 }
 0x674   :  { %v815_v35 = vpop.f32.mrf.mxu1 }
 0x675   :  { %1076 = vtanh.f32 %v815_v35 }
 0x676   :  { %v1047_v36 = vpop.f32.mrf.mxu1 }
 0x678   :  { %v820_v37 = vpop.f32.mrf.mxu1 }
 0x679   :  { %1078 = vtanh.f32 %v820_v37 }
 0x67a   :  { %v1050_v15 = vpop.f32.mrf.mxu1 }
 0x67e   :  { %v1075_v38 = vpop.eup %1074 }
 0x67f   :  { %830 = vrot.lane.b32.xlu0 %v1075_v38, %s1084_s9 }
 0x682   :  { %v1077_v39 = vpop.eup %1076 }
 0x683   :  { %832 = vrot.lane.b32.xlu1 %v1077_v39, %s1084_s9 }
 0x686   :  { %v1079_v16 = vpop.eup %1078 }
 0x687   :  { %834 = vrot.lane.b32.xlu0 %v1079_v16, %s1084_s9 }
 0x6f1   :  { %v831_v0 = vpop.permute.xlu0 %830 }
 0x6f2   :  { %840 = vst.msk [vmem:[%s1371_s10] sm:$0xff] %vm839_vm10, %v831_v0 }
 0x6f5   :  { %v833_v17 = vpop.permute.xlu1 %832 }
 0x6f6   :  { %841 = vst.msk [vmem:[%s1371_s10 + $0x8] sm:$0xff] %vm839_vm10, %v833_v17 }
 0x6f9   :  { %v835_v40 = vpop.permute.xlu0 %834 }
 0x6fa   :  { %843 = vst.msk [vmem:[%s1371_s10 + $0x10] sm:$0xf] %vm842_vm11, %v835_v40 }

// kernel: dgcnn_forward.3
= control target key start
LH: loop header
LB: loop body
LE: loop exit
PB: predicated region body
PF: predicated region fallthrough
CT: control target
= control target key end

     0   :  { %vm66_vm0 = vcmask 1040384   ;;  %v929_v1 = vmov 0.0   ;;  %vm930_vm1 = vmmov 0   ;;  %s1171_s0 = inlined_call_operand.vmem [shape: f32[20,97], index: 0, kind: input, shape index: {}]   ;;  %s1172_s1 = inlined_call_operand.vmem [shape: f32[97,16], index: 1, kind: input, shape index: {}]   ;;  %s1173_s2 = inlined_call_operand.vmem [shape: f32[1,16], index: 2, kind: input, shape index: {}]   ;;  %s1174_s3 = inlined_call_operand.vmem [shape: f32[80,32], index: 3, kind: input, shape index: {}]   ;;  %s1175_s4 = inlined_call_operand.vmem [shape: f32[1,32], index: 4, kind: input, shape index: {}]   ;;  %s1176_s5 = inlined_call_operand.vmem [shape: f32[32,64], index: 5, kind: input, shape index: {}]   ;;  %s1177_s6 = inlined_call_operand.vmem [shape: f32[1,64], index: 6, kind: input, shape index: {}]   ;;  %s1178_s7 = inlined_call_operand.vmem [shape: f32[64,3], index: 7, kind: input, shape index: {}]   ;;  %s1179_s8 = inlined_call_operand.vmem [shape: f32[1,3], index: 8, kind: input, shape index: {}]   ;;  %s1180_s9 = inlined_call_operand.hbm [shape: f32[2,3], index: 9, kind: output, shape index: {}]  }
   0x1   :  { %v48_v0 = vld [vmem:[%s1172_s1 + $0x60] sm:$0x1]  ;;  %804 = vmatprep.subr.mxu0 %v929_v1  ;;  %v47_v2 = vld [vmem:[%s1172_s1 + $0x58] sm:$0xff]  ;;  %839 = vmatprep.subr.mxu1 %v929_v1  ;;  %v46_v3 = vld [vmem:[%s1172_s1 + $0x50] sm:$0xff] }
   0x2   :  { %805 = vmatpush3.msk.msra.mxu0 %vm66_vm0, %v48_v0  ;;  %830 = vmatprep.mubr.msk.f32.mxu0 %vm930_vm1, %v929_v1  ;;  %v45_v4 = vld [vmem:[%s1172_s1 + $0x48] sm:$0xff] }
   0x3   :  { %806 = vmatprep.subr.mxu0 %v929_v1  ;;  %843 = vmatprep.mubr.msk.f32.mxu1 %vm930_vm1, %v929_v1 }
   0x4   :  { %807 = vmatpush3.msra.mxu0 %v47_v2 }
   0x5   :  { %808 = vmatprep.subr.mxu0 %v929_v1 }
   0x6   :  { %14 = vsyncpa [#allocation3], 0  ;;  %809 = vmatpush3.msra.mxu0 %v46_v3  ;;  %v44_v5 = vld [vmem:[%s1172_s1 + $0x40] sm:$0xff]  ;;  %v43_v6 = vld [vmem:[%s1172_s1 + $0x38] sm:$0xff]  ;;  %vm56_vm2 = vcmask 793600   ;;  %vm155_vm3 = vcmask 1045504  }
   0x7   :  { %810 = vmatprep.subr.mxu0 %v929_v1  ;;  %v42_v7 = vld [vmem:[%s1172_s1 + $0x30] sm:$0xff]  ;;  %v41_v8 = vld [vmem:[%s1172_s1 + $0x28] sm:$0xff]  ;;  %v40_v9 = vld [vmem:[%s1172_s1 + $0x20] sm:$0xff]  ;;  %vm166_vm4 = vcmask 130048   ;;  %vm557_vm5 = vcmask 261120   ;;  %vm654_vm6 = vcmask 523264  }
   0x8   :  { %811 = vmatpush3.msra.mxu0 %v45_v4  ;;  %v39_v10 = vld [vmem:[%s1172_s1 + $0x18] sm:$0xff]  ;;  %v38_v11 = vld [vmem:[%s1172_s1 + $0x10] sm:$0xff]  ;;  %v37_v12 = vld [vmem:[%s1172_s1 + $0x8] sm:$0xff]  ;;  %s931_s19 = smov [#allocation2]   ;;  %vm728_vm7 = vcmask 17408  }
   0x9   :  { %812 = vmatprep.subr.mxu0 %v929_v1  ;;  %v36_v13 = vld [vmem:[%s1172_s1] sm:$0xff]  ;;  %v34_v15 = vld [vmem:[%s1171_s0 + $0x8] sm:$0xff]  ;;  %v35_v16 = vld [vmem:[%s1171_s0 + $0x10] sm:$0xf]  ;;  %s736_s20 = sshll.u32 %s931_s19, 4  ;;  %s737_s20 = int_to_ptr.vmem [resolvable:$true] %s736_s20 }
   0xa   :  { %813 = vmatpush3.msra.mxu0 %v44_v5  ;;  %v33_v14 = vld [vmem:[%s1171_s0] sm:$0xff]  ;;  %v165_v17 = vld [vmem:[%s1174_s3 + $0x8] sm:$0xff]  ;;  %v248_v36 = vld [vmem:[%s1174_s3 + $0x18] sm:$0xff]  ;;  %p912_p1 = scmp.lt.s32.totalorder %s737_s20, %s737_s20 }
   0xb   :  { %814 = vmatprep.subr.mxu0 %v929_v1  ;;  %840 = vmatpush3.msra.mxu1 %v165_v17  ;;  %v164_v18 = vld [vmem:[%s1174_s3] sm:$0xff]  ;;  %v247_v37 = vld [vmem:[%s1174_s3 + $0x10] sm:$0xff]  ;;  %v324_v39 = vld [vmem:[%s1174_s3 + $0x28] sm:$0xff] }
   0xc   :  { %815 = vmatpush3.msra.mxu0 %v43_v6  ;;  %841 = vmatprep.subr.mxu1 %v929_v1  ;;  %v744_v21 = vld [vmem:[%s1173_s2] ss:$0 sm:$0xff]  ;;  %v400_v42 = vld [vmem:[%s1174_s3 + $0x38] sm:$0xff]  ;;  %v399_v43 = vld [vmem:[%s1174_s3 + $0x30] sm:$0xff] }
   0xd   :  { %816 = vmatprep.subr.mxu0 %v929_v1  ;;  %842 = vmatpush3.msra.mxu1 %v164_v18  ;;  %v323_v40 = vld [vmem:[%s1174_s3 + $0x20] sm:$0xff]  ;;  %v476_v45 = vld [vmem:[%s1174_s3 + $0x48] sm:$0xff]  ;;  %v556_v48 = vld [vmem:[%s1176_s5 + $0x18] sm:$0xff] }
   0xe   :  { %817 = vmatpush3.msra.mxu0 %v42_v7  ;;  %846 = vmatprep.subr.mxu1 %v929_v1  ;;  %v475_v46 = vld [vmem:[%s1174_s3 + $0x40] sm:$0xff]  ;;  %v555_v49 = vld [vmem:[%s1176_s5 + $0x10] sm:$0xff]  ;;  %v554_v50 = vld [vmem:[%s1176_s5 + $0x8] sm:$0xff] }
   0xf   :  { %818 = vmatprep.subr.mxu0 %v929_v1  ;;  %v553_v51 = vld [vmem:[%s1176_s5] sm:$0xff]  ;;  %v646_v52 = vld [vmem:[%s1178_s7 + $0x38] sm:$0xff]  ;;  %v645_v53 = vld [vmem:[%s1178_s7 + $0x30] sm:$0xff] }
  0x10   :  { %819 = vmatpush3.msra.mxu0 %v41_v8  ;;  %v644_v54 = vld [vmem:[%s1178_s7 + $0x28] sm:$0xff]  ;;  %v643_v55 = vld [vmem:[%s1178_s7 + $0x20] sm:$0xff]  ;;  %v642_v56 = vld [vmem:[%s1178_s7 + $0x18] sm:$0xff] }
  0x11   :  { %820 = vmatprep.subr.mxu0 %v929_v1  ;;  %v750_v60 = vld [vmem:[%s1175_s4] ss:$0 sm:$0xff] }
  0x12   :  { %821 = vmatpush3.msra.mxu0 %v40_v9 }
  0x13   :  { %822 = vmatprep.subr.mxu0 %v929_v1 }
  0x14   :  { %823 = vmatpush3.msra.mxu0 %v39_v10 }
  0x15   :  { %824 = vmatprep.subr.mxu0 %v929_v1 }
  0x16   :  { %825 = vmatpush3.msra.mxu0 %v38_v11  ;;  %v641_v11 = vld [vmem:[%s1178_s7 + $0x10] sm:$0xff] }
  0x17   :  { %826 = vmatprep.subr.mxu0 %v929_v1 }
  0x18   :  { %827 = vmatpush3.msra.mxu0 %v37_v12  ;;  %v640_v12 = vld [vmem:[%s1178_s7 + $0x8] sm:$0xff] }
  0x19   :  { %828 = vmatprep.subr.mxu0 %v929_v1 }
  0x1a   :  { %829 = vmatpush3.msra.mxu0 %v36_v13  ;;  %v639_v13 = vld [vmem:[%s1178_s7] sm:$0xff]  ;;  %s907_s7 = scalar_lea.vmem %s737_s20, 32 }
  0x1b   :  { %831 = vmatmul.mubr.msk.f32.vlgmr.msra.gmra.mxu0 %vm56_vm2, %v33_v14  ;;  %885 = vmatprep.subr.mxu0 %v929_v1  ;;  %v756_v14 = vld [vmem:[%s1177_s6] ss:$0 sm:$0xff]  ;;  %p908_p0 = scmp.ne.s32.totalorder %s737_s20, %s907_s7  ;;  %p913_p2 = scmp.lt.s32.totalorder %s907_s7, %s907_s7 }
  0x1c   :  { %833 = vmatprep.mubr.msk.f32.mxu0 %vm930_vm1, %v929_v1  ;;  %886 = vmatpush3.msra.mxu0 %v646_v52 }
  0x1d   :  { %887 = vmatprep.subr.mxu0 %v929_v1  ;;  %p914_p3 = por %p913_p2, %p912_p1 }
  0x1e   :  { %888 = vmatpush3.msra.mxu0 %v645_v53 }
  0x1f   :  { %834 = vmatmul.mubr.msk.f32.gmra.mxu0 %vm56_vm2, %v34_v15  ;;  %889 = vmatprep.subr.mxu0 %v929_v1  ;;  %p915_p4 = pnand %p914_p3, %p908_p0 }
  0x20   :  { %836 = vmatprep.mubr.msk.f32.mxu0 %vm930_vm1, %v929_v1  ;;  %890 = vmatpush3.msra.mxu0 %v644_v54 }
  0x21   :  { %891 = vmatprep.subr.mxu0 %v929_v1 }
  0x22   :  { %892 = vmatpush3.msra.mxu0 %v643_v55 }
  0x23   :  { %837 = vmatmul.mubr.msk.f32.gmra.mxu0 %vm56_vm2, %v35_v16  ;;  %893 = vmatprep.subr.mxu0 %v929_v1 }
  0x24   :  { %901 = vmatprep.mubr.msk.f32.mxu0 %vm930_vm1, %v929_v1  ;;  %894 = vmatpush3.msra.mxu0 %v642_v56 }
  0x25   :  { %895 = vmatprep.subr.mxu0 %v929_v1 }
  0x26   :  { %896 = vmatpush3.msra.mxu0 %v641_v11 }
  0x27   :  { %897 = vmatprep.subr.mxu0 %v929_v1 }
  0x28   :  { %898 = vmatpush3.msra.mxu0 %v640_v12 }
  0x29   :  { %899 = vmatprep.subr.mxu0 %v929_v1 }
  0x2a   :  { %900 = vmatpush3.msra.mxu0 %v639_v13 }
  0xdb   :  { %v136_v19 = vpop.f32.mrf.mxu0 }
  0xdc   :  { %v137_v28 = vadd.f32 %v744_v21, %v136_v19  ;;  %v757_v19 = vld [vmem:[%s1179_s8] ss:$0 sm:$0xff] }
  0xdd   :  { %v832_v20 = vpop.f32.mrf.mxu0 }
  0xde   :  { %v150_v33 = vmax.f32 %v137_v28, 0.0 }
  0xdf   :  { %v141_v22 = vpop.f32.mrf.mxu0 }
  0xe0   :  { %v142_v23 = vadd.f32 %v744_v21, %v141_v22 }
  0xe1   :  { %v835_v24 = vpop.f32.mrf.mxu0 }
  0xe2   :  { %v151_v26 = vmax.f32 %v142_v23, 0.0 }
  0xe3   :  { %v146_v25 = vpop.f32.mrf.mxu0 }
  0xe4   :  { %v147_v27 = vadd.f32 %v744_v21, %v146_v25  ;;  %v156_v31 = vrot.slane %v151_v26, 2 }
  0xe5   :  { %v838_v29 = vpop.f32.mrf.mxu0 }
  0xe6   :  { %v152_v30 = vmax.f32 %v147_v27, 0.0 }
  0xe8   :  { %v157_v32 = vrot.slane %v152_v30, 2 }
  0xea   :  { %v158_v34 = vsel %vm155_vm3, %v156_v31, %v157_v32  ;;  %v162_v47 = vmax.f32 %v151_v26, %v157_v32 }
  0xeb   :  { %v161_v35 = vmax.f32 %v150_v33, %v158_v34 }
  0xed   :  { %844 = vmatmul.mubr.msk.f32.vlgmr.msra.gmra.mxu1 %vm166_vm4, %v161_v35  ;;  %v249_v38 = vrot.slane %v161_v35, 2  ;;  %v325_v41 = vrot.slane %v161_v35, 4  ;;  %v401_v44 = vrot.slane %v161_v35, 6 }
  0xee   :  { %847 = vmatpush3.msra.mxu1 %v248_v36  ;;  %850 = vmatprep.mubr.msk.f32.mxu1 %vm930_vm1, %v929_v1 }
  0xef   :  { %848 = vmatprep.subr.mxu1 %v929_v1 }
  0xf0   :  { %849 = vmatpush3.msra.mxu1 %v247_v37 }
  0xf1   :  { %853 = vmatprep.subr.mxu1 %v929_v1  ;;  %851 = vmatmul.mubr.msk.f32.vlgmr.msra.gmra.mxu1 %vm166_vm4, %v249_v38 }
  0xf2   :  { %854 = vmatpush3.msra.mxu1 %v324_v39  ;;  %857 = vmatprep.mubr.msk.f32.mxu1 %vm930_vm1, %v929_v1 }
  0xf3   :  { %855 = vmatprep.subr.mxu1 %v929_v1 }
  0xf4   :  { %856 = vmatpush3.msra.mxu1 %v323_v40 }
  0xf5   :  { %860 = vmatprep.subr.mxu1 %v929_v1  ;;  %858 = vmatmul.mubr.msk.f32.vlgmr.msra.gmra.mxu1 %vm166_vm4, %v325_v41 }
  0xf6   :  { %861 = vmatpush3.msra.mxu1 %v400_v42  ;;  %864 = vmatprep.mubr.msk.f32.mxu1 %vm930_vm1, %v929_v1 }
  0xf7   :  { %862 = vmatprep.subr.mxu1 %v929_v1 }
  0xf8   :  { %863 = vmatpush3.msra.mxu1 %v399_v43 }
  0xf9   :  { %867 = vmatprep.subr.mxu1 %v929_v1  ;;  %865 = vmatmul.mubr.msk.f32.vlgmr.msra.gmra.mxu1 %vm166_vm4, %v401_v44 }
  0xfa   :  { %868 = vmatpush3.msra.mxu1 %v476_v45  ;;  %871 = vmatprep.mubr.msk.f32.mxu1 %vm930_vm1, %v929_v1 }
  0xfb   :  { %869 = vmatprep.subr.mxu1 %v929_v1 }
  0xfc   :  { %870 = vmatpush3.msra.mxu1 %v475_v46 }
  0xfd   :  { %872 = vmatmul.mubr.msk.f32.vlgmr.msra.gmra.mxu1 %vm166_vm4, %v162_v47  ;;  %874 = vmatprep.subr.mxu1 %v929_v1 }
  0xfe   :  { %882 = vmatprep.mubr.msk.f32.mxu1 %vm930_vm1, %v929_v1  ;;  %875 = vmatpush3.msra.mxu1 %v556_v48 }
  0xff   :  { %876 = vmatprep.subr.mxu1 %v929_v1 }
 0x100   :  { %877 = vmatpush3.msra.mxu1 %v555_v49 }
 0x101   :  { %878 = vmatprep.subr.mxu1 %v929_v1 }
 0x102   :  { %879 = vmatpush3.msra.mxu1 %v554_v50 }
 0x103   :  { %880 = vmatprep.subr.mxu1 %v929_v1 }
 0x104   :  { %881 = vmatpush3.msra.mxu1 %v553_v51 }
 0x1ad   :  { %v236_v57 = vpop.f32.mrf.mxu1 }
 0x1ae   :  { %v246_v63 = vadd.f32 %v750_v60, %v236_v57 }
 0x1af   :  { %v845_v58 = vpop.f32.mrf.mxu1 }
 0x1b1   :  { %v318_v59 = vpop.f32.mrf.mxu1 }
 0x1b2   :  { %v322_v2 = vadd.f32 %v318_v59, %v246_v63 }
 0x1b3   :  { %v852_v61 = vpop.f32.mrf.mxu1 }
 0x1b5   :  { %v394_v62 = vpop.f32.mrf.mxu1 }
 0x1b6   :  { %v398_v4 = vadd.f32 %v394_v62, %v322_v2 }
 0x1b7   :  { %v859_v0 = vpop.f32.mrf.mxu1 }
 0x1b9   :  { %v470_v3 = vpop.f32.mrf.mxu1 }
 0x1ba   :  { %v474_v6 = vadd.f32 %v470_v3, %v398_v4 }
 0x1bb   :  { %v866_v5 = vpop.f32.mrf.mxu1 }
 0x1bd   :  { %v546_v7 = vpop.f32.mrf.mxu1 }
 0x1be   :  { %v550_v8 = vadd.f32 %v546_v7, %v474_v6 }
 0x1bf   :  { %v873_v9 = vpop.f32.mrf.mxu1 }
 0x1c0   :  { %v551_v10 = vmax.f32 %v550_v8, 0.0 }
 0x1c2   :  { %883 = vmatmul.mubr.msk.f32.vlgmr.msra.gmra.mxu1 %vm557_vm5, %v551_v10 }
 0x282   :  { %v627_v15 = vpop.f32.mrf.mxu1 }
 0x283   :  { %v637_v16 = vadd.f32 %v756_v14, %v627_v15 }
 0x284   :  { %v884_v17 = vpop.f32.mrf.mxu1 }
 0x285   :  { %v638_v18 = vmax.f32 %v637_v16, 0.0 }
 0x287   :  { %902 = vmatmul.mubr.msk.f32.vlgmr.msra.gmra.mxu0 %vm654_vm6, %v638_v18 }
 0x347   :  { %v724_v1 = vpop.f32.mrf.mxu0 }
 0x348   :  { %v725_v20 = vadd.f32 %v757_v19, %v724_v1 }
 0x349   :  { %v903_v21 = vpop.f32.mrf.mxu0 }
 0x34a   :  { %729 = vst.msk [vmem:[#allocation2] sm:$0x3] %vm728_vm7, %v725_v20 }
 0x34b   :  { %918 = shalt.err (!%p915_p4)
}
 0x34c   :  { %739 = dma.vmem_to_hbm [thread:$0]  %s737_s20, 32, %s1180_s9, [#allocation3]  }
 0x34d   :  { %927 = dma.done.wait [#allocation3], 32  }
 0x34e   :  { %928 = vsyncadd [#allocation3], 4294967264 }
 0x34f   :  { %743 = vsyncpa [#allocation3], 1 }

</bundles_post_ra>
